<compile_context>
chip_gen: v7x
topology: tpu7x:2x2x1
jax: 0.10.0
libtpu: 0.0.40
codegen_flags: <defaults>
</compile_context>

<pallas_src>
import functools

import jax
import jax.numpy as jnp
from jax import lax
from jax.experimental import pallas as pl
from jax.experimental.pallas import tpu as pltpu


def _round_up(x: int, m: int) -> int:
    return ((x + m - 1) // m) * m


def _vmem_budget_bytes() -> int:
    """Generation-aware VMEM planning budget: ~56 MiB on v7x (64 MiB parts),
    capped at ~100 MiB on v5e/v6e (128 MiB parts)."""
    try:
        cap = int(pltpu.get_tpu_info().vmem_capacity_bytes)
    except Exception:
        cap = 64 << 20  # conservative: assume a v7x-sized part
    return min(cap - (8 << 20), 100 << 20)


def _pick_feature_block(num_features: int, c_pad: int, d_pad: int, budget: int) -> int:
    """Features per table K-block so the bf16 table block(s) fit comfortably in VMEM."""
    bytes_per_feat = c_pad * d_pad * 2  # bf16
    if num_features * bytes_per_feat <= budget // 2:
        return num_features  # whole table resident (single buffer)
    for d in sorted((d for d in range(1, num_features) if num_features % d == 0), reverse=True):
        if 2 * d * bytes_per_feat <= budget // 2:  # double-buffered K blocks
            return d
    return 1


def _embed_kernel(idx_ref, invm_ref, table_ref, out_ref, *, fk: int, c_pad: int, num_k: int):
    # idx_ref   block: (TB, F)       int32   per-column category indices (valid / clamped)
    # invm_ref  block: (TB, F)       float32 (1 - mask)
    # table_ref block: (TK, D_pad)   bf16    block-diagonal packed tables, TK = fk * c_pad
    # out_ref   block: (TB, D_pad)   float32 lane-dense concatenated embeddings (resident over k)
    k = pl.program_id(1)

    @pl.when(k == 0)
    def _init():
        out_ref[...] = jnp.zeros_like(out_ref)

    idx = idx_ref[...]      # (TB, F)
    invm = invm_ref[...]    # (TB, F)
    tb = idx.shape[0]

    if num_k == 1:
        idx_blk, invm_blk = idx, invm
    else:
        start = k * fk
        idx_blk = lax.dynamic_slice(idx, (0, start), (tb, fk))
        invm_blk = lax.dynamic_slice(invm, (0, start), (tb, fk))

    # One C_pad-wide compare per feature, written into its static column slice:
    # total VALU work O(TB * TK) (vs O(F * TB * K) for full-width passes).
    lane = lax.broadcasted_iota(jnp.int32, (tb, c_pad), 1)
    pieces = []
    for j in range(fk):  # static, small
        hit = lane == idx_blk[:, j:j + 1]
        pieces.append(jnp.where(hit, invm_blk[:, j:j + 1], 0.0).astype(jnp.bfloat16))
    onehot = pieces[0] if fk == 1 else jnp.concatenate(pieces, axis=1)  # (TB, TK) bf16

    # Single bf16 MXU matmul: gather + mask + concat in one shot, f32 accumulation into the
    # resident output tile (reduction over the K grid axis).
    out_ref[...] += jnp.dot(onehot, table_ref[...], preferred_element_type=jnp.float32)


def categorical_embeddings_forward(categorical_features, mask, table_bd, cat_sizes,
                                   embed_dims, c_pad):
    """
    categorical_features: [B, F] int32 per-column indices
    mask:                 [B, F] float (1.0 = missing) or None
    table_bd:             [F*c_pad, D_pad] bf16 block-diagonal packed embedding tables
    cat_sizes:            tuple of per-column category counts (static)
    embed_dims:           tuple of per-column embedding dims (static)
    c_pad:                per-feature row stride in table_bd (static, multiple of 16)
    returns:              [B, sum(embed_dims)] float32
    """
    B, F = categorical_features.shape
    total_dim = int(sum(embed_dims))
    if F == 0:
        return jnp.zeros((B, 0), jnp.float32)
    K, D_pad = table_bd.shape

    budget = _vmem_budget_bytes()

    # --- K (table) tiling -------------------------------------------------------------
    fk = _pick_feature_block(F, c_pad, D_pad, budget)
    num_k = F // fk
    TK = fk * c_pad
    table_bufs = 1 if num_k == 1 else 2

    # --- batch tiling -----------------------------------------------------------------
    # Largest row tile (multiple of 8, <= 1024) whose double-buffered idx/mask/out tiles plus
    # the resident table block(s) fit the budget; fatter tiles amortize per-grid-step overhead.
    per_row = 2 * (F * 4 + F * 4 + D_pad * 4)
    avail = int(budget * 0.8) - table_bufs * TK * D_pad * 2
    tb_cap = max(8, min(1024, (max(avail, 0) // max(per_row, 1)) // 8 * 8))
    B8 = _round_up(B, 8)
    TB = B8 if B8 <= tb_cap else tb_cap
    B_pad = _round_up(B8, TB)
    # v7x has two TensorCores: give the "parallel" batch axis >= 2 steps when possible.
    if B_pad // TB < 2 and B_pad >= 16:
        n = B_pad // 8
        TB = 8 * max(d for d in range(1, n) if n % d == 0)

    # --- host-side prep ---------------------------------------------------------------
    sizes = jnp.asarray(cat_sizes, jnp.int32)[None, :]
    idx = jnp.clip(categorical_features.astype(jnp.int32), 0, sizes - 1)  # bounds safety
    if mask is None:
        invm = jnp.ones((B, F), jnp.float32)
    else:
        invm = 1.0 - mask.astype(jnp.float32)
    if B_pad != B:
        idx = jnp.pad(idx, ((0, B_pad - B), (0, 0)))
        invm = jnp.pad(invm, ((0, B_pad - B), (0, 0)))

    # --- VMEM limit from real residency (real buffer counts, no arbitrary multiplier) --
    resid = (2 * TB * F * 4) * 2 \
            + 2 * TB * D_pad * 4 \
            + table_bufs * TK * D_pad * 2 \
            + TB * TK * 2 + TB * D_pad * 4  # in-kernel one-hot / dot temporaries
    vmem_limit = int(min(budget, max(2 * resid, 8 << 20)))

    kernel = functools.partial(_embed_kernel, fk=fk, c_pad=c_pad, num_k=num_k)

    # Table spec: constant index_map when the whole table is resident -> single buffer.
    if table_bufs == 1:
        try:
            table_spec = pl.BlockSpec((TK, D_pad), lambda i, k: (k, 0),
                                      pipeline_mode=pl.Buffered(1))
        except Exception:  # older jax without pipeline_mode on BlockSpec
            table_spec = pl.BlockSpec((TK, D_pad), lambda i, k: (k, 0))
    else:
        table_spec = pl.BlockSpec((TK, D_pad), lambda i, k: (k, 0))

    out = pl.pallas_call(
        kernel,
        out_shape=jax.ShapeDtypeStruct((B_pad, D_pad), jnp.float32),
        grid_spec=pltpu.PrefetchScalarGridSpec(
            num_scalar_prefetch=0,
            grid=(B_pad // TB, num_k),              # reduction (table K) axis last
            in_specs=[
                pl.BlockSpec((TB, F), lambda i, k: (i, 0)),
                pl.BlockSpec((TB, F), lambda i, k: (i, 0)),
                table_spec,
            ],
            out_specs=pl.BlockSpec((TB, D_pad), lambda i, k: (i, 0)),
        ),
        compiler_params=pltpu.CompilerParams(
            dimension_semantics=("parallel", "arbitrary"),
            vmem_limit_bytes=vmem_limit,
        ),
    )(idx, invm, table_bd)

    # Output is already in concatenated column order; one lane-dense slice.
    return out[:B, :total_dim]


def build_tables(categorical_dims, embedding_dims, key):
    """nn.Embedding-like init (N(0,1)), padding_idx=0 row zeroed.  Packs all columns into a
    block-diagonal bf16 table [F*C_pad, D_pad] with C_pad a multiple of 16 (bf16 packing)."""
    cols = list(categorical_dims.keys())
    cat_sizes = [categorical_dims[c] for c in cols]
    emb_sizes = [embedding_dims[c] for c in cols]
    F = len(cols)
    c_pad = _round_up(max(cat_sizes), 16)
    d_pad = _round_up(sum(emb_sizes), 128)

    table = jnp.zeros((F * c_pad, d_pad), jnp.float32)
    raw_tables = []
    col_off = 0
    for i in range(F):
        k = jax.random.fold_in(key, i)
        w = jax.random.normal(k, (cat_sizes[i], emb_sizes[i]), dtype=jnp.float32)
        w = w.at[0].set(0.0)  # padding_idx=0
        raw_tables.append(w.astype(jnp.bfloat16))
        table = table.at[i * c_pad: i * c_pad + cat_sizes[i],
                         col_off: col_off + emb_sizes[i]].set(w)
        col_off += emb_sizes[i]
    return table.astype(jnp.bfloat16), raw_tables, tuple(cat_sizes), tuple(emb_sizes), c_pad


def reference_forward(categorical_features, mask, raw_tables):
    """Pure-JAX reference (per-column gather) using the same bf16 weights."""
    outs = []
    for f, tab in enumerate(raw_tables):
        emb = jnp.take(tab, categorical_features[:, f], axis=0).astype(jnp.float32)
        emb = emb * (1.0 - mask[:, f:f + 1])
        outs.append(emb)
    return jnp.concatenate(outs, axis=1)


if __name__ == "__main__":
    key = jax.random.PRNGKey(0)

    categorical_dims = {"color": 7, "size.bucket": 5, "country": 11}
    embedding_dims = {"color": 8, "size.bucket": 4, "country": 16}
    batch = 8
    num_features = len(categorical_dims)

    table_bd, raw_tables, cat_sizes, emb_sizes, c_pad = build_tables(
        categorical_dims, embedding_dims, jax.random.fold_in(key, 100)
    )

    # deterministic example inputs
    k_idx, k_mask = jax.random.split(jax.random.fold_in(key, 200))
    max_cat = jnp.asarray(cat_sizes, jnp.int32)
    raw = jax.random.randint(k_idx, (batch, num_features), 0, 10_000, dtype=jnp.int32)
    categorical_features = raw % max_cat[None, :]                       # valid per-column indices
    mask = (jax.random.uniform(k_mask, (batch, num_features)) < 0.25).astype(jnp.float32)

    out = categorical_embeddings_forward(
        categorical_features, mask, table_bd, cat_sizes, emb_sizes, c_pad)
    out = jax.block_until_ready(out)

    ref = reference_forward(categorical_features, mask, raw_tables)
    assert out.shape == (batch, sum(emb_sizes)), out.shape
    assert jnp.allclose(out, ref, atol=1e-5, rtol=1e-5), "mismatch vs reference"

    print("KERNEL_OK")
</pallas_src>

<mosaic_0001>
module attributes {stable_mosaic.version = 11 : i64} {
  func.func @_embed_kernel(%arg0: i32, %arg1: i32, %arg2: memref<8x3xi32, #tpu.memory_space<vmem>>, %arg3: memref<8x3xf32, #tpu.memory_space<vmem>>, %arg4: memref<48x128xbf16, #tpu.memory_space<vmem>>, %arg5: memref<8x128xf32, #tpu.memory_space<vmem>>) attributes {dimension_semantics = [#tpu.dimension_semantics<parallel>, #tpu.dimension_semantics<arbitrary>], iteration_bounds = array<i64: 1, 1>, scalar_prefetch = 0 : i64, scratch_operands = 0 : i64, tpu.core_type = #tpu.core_type<tc>, window_params = [{transform_indices = @transform_0, window_bounds = array<i64: 8, 3>}, {transform_indices = @transform_1, window_bounds = array<i64: 8, 3>}, {pipeline_mode = #tpu.pipeline_mode<synchronous>, transform_indices = @transform_2, window_bounds = array<i64: 48, 128>}, {transform_indices = @transform_3, window_bounds = array<i64: 8, 128>}]} {
    %c0_i32 = arith.constant 0 : i32
    %0 = arith.cmpi eq, %arg1, %c0_i32 : i32
    %1 = arith.extui %0 : i1 to i32
    %c0_i32_0 = arith.constant 0 : i32
    %2 = arith.cmpi ne, %1, %c0_i32_0 : i32
    scf.if %2 {
      %cst_13 = arith.constant 0.000000e+00 : f32
      %39 = vector.broadcast %cst_13 : f32 to vector<8x128xf32>
      %c0_14 = arith.constant 0 : index
      %c0_15 = arith.constant 0 : index
      %40 = vector.load %arg5[%c0_14, %c0_15] : memref<8x128xf32, #tpu.memory_space<vmem>>, vector<8x128xf32>
      tpu.vector_store %arg5[%c0_14, %c0_15], %39 {strides = array<i32>} : memref<8x128xf32, #tpu.memory_space<vmem>>, vector<8x128xf32>,
    } else {
    }
    %c0 = arith.constant 0 : index
    %c0_1 = arith.constant 0 : index
    %3 = vector.load %arg2[%c0, %c0_1] : memref<8x3xi32, #tpu.memory_space<vmem>>, vector<8x3xi32>
    %c0_2 = arith.constant 0 : index
    %c0_3 = arith.constant 0 : index
    %4 = vector.load %arg3[%c0_2, %c0_3] : memref<8x3xf32, #tpu.memory_space<vmem>>, vector<8x3xf32>
    %5 = tpu.iota {dimensions = array<i32: 1>} : vector<8x16xi32>
    %6 = vector.extract_strided_slice %3 {offsets = [0, 0], sizes = [8, 1], strides = [1, 1]} : vector<8x3xi32> to vector<8x1xi32>
    %7 = vector.broadcast %6 : vector<8x1xi32> to vector<8x16xi32>
    %8 = arith.cmpi eq, %5, %7 : vector<8x16xi32>
    %9 = vector.extract_strided_slice %4 {offsets = [0, 0], sizes = [8, 1], strides = [1, 1]} : vector<8x3xf32> to vector<8x1xf32>
    %cst = arith.constant 0.000000e+00 : f32
    %10 = vector.shape_cast %9 : vector<8x1xf32> to vector<8x1xf32>
    %11 = vector.broadcast %10 : vector<8x1xf32> to vector<8x16xf32>
    %12 = vector.broadcast %cst : f32 to vector<8x16xf32>
    %13 = arith.select %8, %11, %12 : vector<8x16xi1>, vector<8x16xf32>
    %14 = arith.truncf %13 : vector<8x16xf32> to vector<8x16xbf16>
    %15 = vector.extract_strided_slice %3 {offsets = [0, 1], sizes = [8, 1], strides = [1, 1]} : vector<8x3xi32> to vector<8x1xi32>
    %16 = vector.broadcast %15 : vector<8x1xi32> to vector<8x16xi32>
    %17 = arith.cmpi eq, %5, %16 : vector<8x16xi32>
    %18 = vector.extract_strided_slice %4 {offsets = [0, 1], sizes = [8, 1], strides = [1, 1]} : vector<8x3xf32> to vector<8x1xf32>
    %cst_4 = arith.constant 0.000000e+00 : f32
    %19 = vector.shape_cast %18 : vector<8x1xf32> to vector<8x1xf32>
    %20 = vector.broadcast %19 : vector<8x1xf32> to vector<8x16xf32>
    %21 = vector.broadcast %cst_4 : f32 to vector<8x16xf32>
    %22 = arith.select %17, %20, %21 : vector<8x16xi1>, vector<8x16xf32>
    %23 = arith.truncf %22 : vector<8x16xf32> to vector<8x16xbf16>
    %24 = vector.extract_strided_slice %3 {offsets = [0, 2], sizes = [8, 1], strides = [1, 1]} : vector<8x3xi32> to vector<8x1xi32>
    %25 = vector.broadcast %24 : vector<8x1xi32> to vector<8x16xi32>
    %26 = arith.cmpi eq, %5, %25 : vector<8x16xi32>
    %27 = vector.extract_strided_slice %4 {offsets = [0, 2], sizes = [8, 1], strides = [1, 1]} : vector<8x3xf32> to vector<8x1xf32>
    %cst_5 = arith.constant 0.000000e+00 : f32
    %28 = vector.shape_cast %27 : vector<8x1xf32> to vector<8x1xf32>
    %29 = vector.broadcast %28 : vector<8x1xf32> to vector<8x16xf32>
    %30 = vector.broadcast %cst_5 : f32 to vector<8x16xf32>
    %31 = arith.select %26, %29, %30 : vector<8x16xi1>, vector<8x16xf32>
    %32 = arith.truncf %31 : vector<8x16xf32> to vector<8x16xbf16>
    %33 = tpu.concatenate %14, %23, %32 in 1 : vector<8x16xbf16>, vector<8x16xbf16>, vector<8x16xbf16> -> vector<8x48xbf16>
    %c0_6 = arith.constant 0 : index
    %c0_7 = arith.constant 0 : index
    %34 = vector.load %arg5[%c0_6, %c0_7] : memref<8x128xf32, #tpu.memory_space<vmem>>, vector<8x128xf32>
    %c0_8 = arith.constant 0 : index
    %c0_9 = arith.constant 0 : index
    %35 = vector.load %arg4[%c0_8, %c0_9] : memref<48x128xbf16, #tpu.memory_space<vmem>>, vector<48x128xbf16>
    %cst_10 = arith.constant dense<0.000000e+00> : vector<8x128xf32>
    %36 = tpu.matmul %33, %35, %cst_10 {dimension_numbers = #tpu.dot_dimension_numbers<[1], [0], [0], [1], [0, 0, 1, 1], [], []>} : vector<8x48xbf16>, vector<48x128xbf16>, vector<8x128xf32> -> vector<8x128xf32>
    %37 = arith.addf %34, %36 : vector<8x128xf32>
    %c0_11 = arith.constant 0 : index
    %c0_12 = arith.constant 0 : index
    %38 = vector.load %arg5[%c0_11, %c0_12] : memref<8x128xf32, #tpu.memory_space<vmem>>, vector<8x128xf32>
    tpu.vector_store %arg5[%c0_11, %c0_12], %37 {strides = array<i32>} : memref<8x128xf32, #tpu.memory_space<vmem>>, vector<8x128xf32>,
    return
  }
  func.func @transform_0(%arg0: i32, %arg1: i32) -> (i32, i32) {
    %c0_i32 = arith.constant 0 : i32
    %c0_i32_0 = arith.constant 0 : i32
    return %arg0, %c0_i32 : i32, i32
  }
  func.func @transform_1(%arg0: i32, %arg1: i32) -> (i32, i32) {
    %c0_i32 = arith.constant 0 : i32
    %c0_i32_0 = arith.constant 0 : i32
    return %arg0, %c0_i32 : i32, i32
  }
  func.func @transform_2(%arg0: i32, %arg1: i32) -> (i32, i32) {
    %c0_i32 = arith.constant 0 : i32
    %c0_i32_0 = arith.constant 0 : i32
    return %arg1, %c0_i32 : i32, i32
  }
  func.func @transform_3(%arg0: i32, %arg1: i32) -> (i32, i32) {
    %c0_i32 = arith.constant 0 : i32
    %c0_i32_0 = arith.constant 0 : i32
    return %arg0, %c0_i32 : i32, i32
  }
}

</mosaic_0001>

<bundles_post_ra>
// kernel: tpu_custom_call.1
= control target key start
LH: loop header
LB: loop body
LE: loop exit
PB: predicated region body
PF: predicated region fallthrough
CT: control target
= control target key end

     0   :  { %v211_v1 = vmov 2   ;;  %v212_v2 = vmov 1   ;;  %s266_s0 = inlined_call_operand.vmem [shape: s32[8,3], index: 0, kind: input, shape index: {}]   ;;  %s267_s1 = inlined_call_operand.vmem [shape: f32[8,3], index: 1, kind: input, shape index: {}]   ;;  %s268_s2 = inlined_call_operand.vmem [shape: bf16[48,128], index: 2, kind: input, shape index: {}]   ;;  %s269_s3 = inlined_call_operand.hbm [shape: f32[8,128], index: 3, kind: output, shape index: {}]  }
   0x1   :  { %v21_v0 = vld [vmem:[%s266_s0] sm:$0xff]  ;;  %180 = vset.pattern.permute.xlu1 %v211_v1  ;;  %179 = vset.pattern.permute.xlu0 %v212_v2 }
   0x2   :  { %47 = vperm.xlu1 %180, %v21_v0   ;;  %37 = vperm.xlu0 %179, %v21_v0   ;;  %v22_v3 = vld [vmem:[%s267_s1] sm:$0xff] }
   0x3   :  { %8 = vsyncpa [#allocation3], 0  ;;  %v184_v4 = vld [vmem:[%s268_s2] sm:$0xff]   ;;  %v213_v5 = vmov 0   ;;  %v214_v6 = vmov 0.0   ;;  %v185_v7 = vld [vmem:[%s268_s2 + $0x8] sm:$0xff]   ;;  %v23_v9 = vlaneseq }
   0x4   :  { %161 = vmatprep.subr.bf16.mxu0 %v214_v6  ;;  %v186_v8 = vld [vmem:[%s268_s2 + $0x10] sm:$0xff]   ;;  %vm215_vm0 = vmmov 0   ;;  %s216_s20 = smov 32   ;;  %s217_s21 = smov 16   ;;  %vm62_vm4 = vcmask 130048   ;;  %vm66_vm5 = vcmask 261120  }
   0x5   :  { %162 = vmatpush3.bf16.msra.mxu0 %v184_v4  ;;  %167 = vmatprep.mubr.msk.bf16.mxu0 %vm215_vm0, %v214_v6  ;;  %v24_v10 = vand.u32 127, %v23_v9  ;;  %vm94_vm6 = vcmask 392192   ;;  %s218_s2 = smov [#allocation2]  }
   0x6   :  { %51 = vperm.xlu1 %180, %v22_v3   ;;  %41 = vperm.xlu0 %179, %v22_v3   ;;  %s145_s22 = sshll.u32 %s218_s2, 4  ;;  %s146_s22 = int_to_ptr.vmem [resolvable:$true] %s145_s22 }
   0x7   :  { %163 = vmatprep.subr.bf16.mxu0 %v214_v6  ;;  %s187_s23 = scalar_lea.vmem %s146_s22, 128  ;;  %p192_p1 = scmp.lt.s32.totalorder %s146_s22, %s146_s22 }
   0x8   :  { %p188_p0 = scmp.ne.s32.totalorder %s146_s22, %s187_s23  ;;  %p193_p2 = scmp.lt.s32.totalorder %s187_s23, %s187_s23 }
   0x9   :  { %164 = vmatpush3.bf16.msra.mxu0 %v185_v7 }
   0xa   :  { %181 = vset.pattern.permute.xlu0 %v213_v5  ;;  %182 = vset.pattern.permute.xlu1 %v213_v5  ;;  %p194_p3 = por %p193_p2, %p192_p1 }
   0xb   :  { %26 = vperm.xlu0 %181, %v21_v0   ;;  %31 = vperm.xlu1 %182, %v22_v3  }
   0xc   :  { %165 = vmatprep.subr.bf16.mxu0 %v214_v6  ;;  %p195_p4 = pnand %p194_p3, %p188_p0 }
   0xd   :  { %166 = vmatpush3.bf16.msra.mxu0 %v186_v8 }
   0xf   :  { %183 = vset.pattern.permute.xlu0 %v211_v1 }
  0x81   :  { %v48_v11 = vpop.permute.xlu1 %47  ;;  %v38_v12 = vpop.permute.xlu0 %37 }
  0x82   :  { %vm49_vm1 = vcmp.eq.s32.totalorder %v24_v10, %v48_v11  ;;  %vm39_vm2 = vcmp.eq.s32.totalorder %v24_v10, %v38_v12 }
  0x85   :  { %v52_v13 = vpop.permute.xlu1 %51  ;;  %v42_v14 = vpop.permute.xlu0 %41 }
  0x86   :  { %v54_v15 = vsel %vm49_vm1, %v52_v13, 0.0  ;;  %v44_v16 = vsel %vm39_vm2, %v42_v14, 0.0 }
  0x87   :  { %v55_v17 = vpack.c.bf16 %v54_v15, %v54_v15  ;;  %v45_v18 = vpack.c.bf16 %v44_v16, %v44_v16 }
  0x89   :  { %60 = vrot.lane.b32.xlu0 %v55_v17, %s216_s20  ;;  %57 = vrot.lane.b32.xlu1 %v45_v18, %s217_s21 }
  0x8a   :  { %v27_v19 = vpop.permute.xlu0 %26  ;;  %v32_v20 = vpop.permute.xlu1 %31 }
  0x8b   :  { %vm28_vm3 = vcmp.eq.s32.totalorder %v24_v10, %v27_v19 }
  0x8c   :  { %v34_v21 = vsel %vm28_vm3, %v32_v20, 0.0 }
  0x8d   :  { %v35_v22 = vpack.c.bf16 %v34_v21, %v34_v21 }
  0xfb   :  { %v58_v23 = vpop.permute.xlu1 %57  ;;  %v61_v24 = vpop.permute.xlu0 %60 }
  0xfc   :  { %v65_v25 = vsel %vm62_vm4, %v35_v22, %v58_v23 }
  0xfd   :  { %v68_v26 = vsel %vm66_vm5, %v65_v25, %v61_v24 }
  0xfe   :  { %168 = vmatmul.mubr.msk.bf16.vlgmr.msra.gmra.mrb[0].mxu0 %vm94_vm6, %v68_v26 }
 0x1d1   :  { %v131_v27 = vpop.f32.mrb[0].mxu0 }
 0x1d2   :  { %v169_v28 = vpop.f32.mrb[1].mxu0  ;;  %138 = vst [vmem:[#allocation2] sm:$0xff] %v131_v27 }
 0x1d3   :  { %v134_v29 = vpop.f32.mrb[2].mxu0 }
 0x1d4   :  { %v170_v30 = vpop.f32.mrb[3].mxu0 }
 0x1d5   :  { %198 = shalt.err (!%p195_p4)
}
 0x1d6   :  { %s199_s26 = scalar_lea.hbm %s269_s3, 128 }
 0x1d7   :  { %p200_p5 = scmp.ne.s32.totalorder %s269_s3, %s199_s26  ;;  %p203_p6 = scmp.lt.u32.totalorder %s199_s26, %s269_s3 }
 0x1d9   :  { %p205_p7 = pnand %p203_p6, %p200_p5 }
 0x1db   :  { %208 = shalt.err (!%p205_p7)
}
 0x1dc   :  { %148 = dma.vmem_to_hbm [thread:$0]  %s146_s22, 128, %s269_s3, [#allocation3]  }
 0x1dd   :  { %209 = dma.done.wait [#allocation3], 128  }
 0x1de   :  { %210 = vsyncadd [#allocation3], 4294967168 }
 0x1df   :  { %152 = vsyncpa [#allocation3], 1 }

</bundles_post_ra>
